<compile_context>
chip_gen: v6e
topology: v6e:2x2x1
jax: 0.10.0
libtpu: 0.0.40
codegen_flags: <defaults>
</compile_context>

<pallas_src>
import math

import jax
import jax.numpy as jnp
from jax.experimental import pallas as pl
from jax.experimental.pallas import tpu as pltpu


def _round_up(a, b):
    return (a + b - 1) // b * b


def _cdiv(a, b):
    return (a + b - 1) // b


def _tpu_info():
    """(physical VMEM bytes per core, MXU lane alignment, has >=2 TensorCores)."""
    kind = ""
    try:
        kind = jax.devices()[0].device_kind.lower()
    except Exception:
        pass
    vmem_phys, mxu_align = 128 << 20, 256          # conservative default
    if ("v5e" in kind) or ("v5 lite" in kind) or ("v5litepod" in kind):
        vmem_phys, mxu_align = 128 << 20, 128
    elif "v6" in kind:
        vmem_phys, mxu_align = 128 << 20, 256
    elif "v7" in kind:
        vmem_phys, mxu_align = 64 << 20, 256
    elif ("v4" in kind) or ("v5p" in kind):
        vmem_phys, mxu_align = 128 << 20, 128
    try:
        queried = int(pltpu.get_tpu_info().vmem_capacity_bytes)
        vmem_phys = min(vmem_phys, queried)
    except Exception:
        pass
    two_cores = any(t in kind for t in ("v4", "v5p", "v7"))
    return vmem_phys, mxu_align, two_cores


# ----------------------------- kernels ------------------------------------ #

def _ffn_resident_kernel(x_ref, w1_ref, b1_ref, w2_ref, b2_ref, o_ref):
    # x_ref: (tm, Dp)  w1_ref/w2_ref: (Dp, Dp) (in, out)  b*: (1, Dp) f32
    b1 = b1_ref[...]
    b2 = b2_ref[...]
    h = jnp.dot(x_ref[...], w1_ref[...],
                preferred_element_type=jnp.float32) + b1
    h = jnp.maximum(h, 0.0)                       # ReLU in f32
    y = jnp.dot(h.astype(w2_ref.dtype), w2_ref[...],
                preferred_element_type=jnp.float32) + b2
    o_ref[...] = y.astype(o_ref.dtype)


def _ffn_stream_kernel(x_ref, w1_ref, b1_ref, w2_ref, b2_ref, o_ref, acc_ref):
    # grid = (row tiles, hidden slabs);  hidden axis is "arbitrary" (inner).
    # x_ref: (tm, Dp)  w1_ref: (Dp, th)  b1_ref: (1, th)
    # w2_ref: (th, Dp) b2_ref: (1, Dp)   acc_ref: (tm, Dp) f32 scratch
    k = pl.program_id(1)

    @pl.when(k == 0)
    def _():
        acc_ref[...] = jnp.broadcast_to(b2_ref[...], acc_ref.shape)

    h = jnp.dot(x_ref[...], w1_ref[...],
                preferred_element_type=jnp.float32) + b1_ref[...]
    h = jnp.maximum(h, 0.0)
    acc_ref[...] += jnp.dot(h.astype(w2_ref.dtype), w2_ref[...],
                            preferred_element_type=jnp.float32)

    @pl.when(k == pl.num_programs(1) - 1)
    def _():
        o_ref[...] = acc_ref[...].astype(o_ref.dtype)


# ----------------------------- wrapper ------------------------------------ #

def feed_forward_block(x, w1, b1, w2, b2, *, tm=None, compute_dtype=None,
                       out_dtype=None, force_streaming=False,
                       hidden_tile=None):
    """out = relu(x @ w1 + b1) @ w2 + b2   (PyTorch Linear -> ReLU -> Linear).

    x : (..., D);  w1, w2 : (D, D) stored (in, out) i.e. torch weight.T;
    b1, b2 : (D,).
    compute_dtype: MXU input dtype (e.g. jnp.bfloat16 for ~2x MXU throughput);
    accumulation is always f32.  out_dtype defaults to x.dtype.
    """
    orig_shape = x.shape
    D = orig_shape[-1]
    rows = math.prod(orig_shape[:-1])
    out_dtype = jnp.dtype(out_dtype or x.dtype)
    compute_dtype = jnp.dtype(compute_dtype or x.dtype)

    vmem_phys, mxu_align, two_cores = _tpu_info()

    x2d = x.reshape(rows, D).astype(compute_dtype)
    w1 = w1.astype(compute_dtype)
    w2 = w2.astype(compute_dtype)

    # --- feature padding: lane-dense + MXU-width aligned (exact: zeros). ---
    # TODO(synk): in a real model, pre-pad/cast the weights once outside the
    # per-call hot path instead of re-padding every invocation.
    align = 128 if D <= 128 else mxu_align
    Dp = _round_up(D, align)
    if Dp != D:
        pad = Dp - D
        x2d = jnp.pad(x2d, ((0, 0), (0, pad)))
        w1 = jnp.pad(w1, ((0, pad), (0, pad)))
        w2 = jnp.pad(w2, ((0, pad), (0, pad)))
        b1 = jnp.pad(b1, (0, pad))
        b2 = jnp.pad(b2, (0, pad))
    b1_2d = b1.reshape(1, Dp).astype(jnp.float32)
    b2_2d = b2.reshape(1, Dp).astype(jnp.float32)

    x_bytes = compute_dtype.itemsize
    w_bytes = x_bytes
    o_bytes = out_dtype.itemsize

    # --- row tile: sublane-packing aligned; no row padding (Pallas handles a
    # ragged last tile, avoiding an extra HBM round trip for x). ------------
    row_align = 8 * max(1, 4 // x_bytes)           # 8 f32 / 16 bf16 / 32 int8
    if tm is None:
        tm = 512 if vmem_phys > (96 << 20) else 256
    tm_eff = max(row_align,
                 min(_round_up(tm, row_align), _round_up(rows, row_align)))
    n_row_steps = _cdiv(rows, tm_eff)
    if two_cores and n_row_steps < 2 and rows > row_align:
        # >=2 grid steps so "parallel" can use both TensorCores.
        tm_eff = _round_up(_cdiv(rows, 2), row_align)
        n_row_steps = _cdiv(rows, tm_eff)

    headroom = 16 << 20
    usable = max(vmem_phys - headroom, 16 << 20)
    flops = 4 * rows * Dp * Dp                     # two matmuls

    # Resident-weight footprint (weights single-buffered, x/out double-buffered,
    # full-width f32 h plus its cast copy).
    resident_bytes = (2 * Dp * Dp * w_bytes
                      + 2 * tm_eff * Dp * x_bytes
                      + 2 * tm_eff * Dp * o_bytes
                      + tm_eff * Dp * (4 + w_bytes)
                      + (2 << 20))
    use_resident = (resident_bytes <= usable) and not force_streaming

    if use_resident:
        bytes_accessed = (rows * Dp * x_bytes + rows * Dp * o_bytes
                          + 2 * Dp * Dp * w_bytes + 2 * Dp * 4)
        cost = pl.CostEstimate(flops=int(flops), transcendentals=0,
                               bytes_accessed=int(bytes_accessed))
        compiler_kwargs = dict(dimension_semantics=("parallel",))
        if 2 * resident_bytes > (16 << 20):
            compiler_kwargs["vmem_limit_bytes"] = int(
                max(32 << 20, min(2 * resident_bytes, usable)))

        def _run(single_buffer_weights):
            const_kwargs = (dict(pipeline_mode=pl.Buffered(1))
                            if single_buffer_weights else {})
            grid_spec = pltpu.PrefetchScalarGridSpec(
                num_scalar_prefetch=0,
                grid=(n_row_steps,),
                in_specs=[
                    pl.BlockSpec((tm_eff, Dp), lambda i: (i, 0)),              # x
                    pl.BlockSpec((Dp, Dp), lambda i: (0, 0), **const_kwargs),  # W1
                    pl.BlockSpec((1, Dp), lambda i: (0, 0), **const_kwargs),   # b1
                    pl.BlockSpec((Dp, Dp), lambda i: (0, 0), **const_kwargs),  # W2
                    pl.BlockSpec((1, Dp), lambda i: (0, 0), **const_kwargs),   # b2
                ],
                out_specs=pl.BlockSpec((tm_eff, Dp), lambda i: (i, 0)),
            )
            return pl.pallas_call(
                _ffn_resident_kernel,
                out_shape=jax.ShapeDtypeStruct((rows, Dp), out_dtype),
                grid_spec=grid_spec,
                cost_estimate=cost,
                compiler_params=pltpu.CompilerParams(**compiler_kwargs),
            )(x2d, w1, b1_2d, w2, b2_2d)

        try:
            # Weights never change across the grid -> single-buffer them.
            out2d = _run(True)
        except (TypeError, ValueError, NotImplementedError,
                pltpu.LoweringException):
            # Only fall back when this JAX version rejects single-buffered
            # pipeline_mode; genuine runtime/VMEM errors propagate.
            out2d = _run(False)
    else:
        # ---- weight-streaming path: stream hidden-dim slabs of W1/W2. -----
        if hidden_tile is not None:
            th = int(hidden_tile)
            if th % 128 != 0 or Dp % th != 0:
                raise ValueError("hidden_tile must be a multiple of 128 that "
                                 "divides the padded feature dim")
        else:
            th = 128
            for cand in (1024, 768, 512, 384, 256, 128):
                if Dp % cand:
                    continue
                est = (2 * Dp * cand * w_bytes + 2 * cand * Dp * w_bytes
                       + 2 * tm_eff * Dp * x_bytes + 2 * tm_eff * Dp * o_bytes
                       + tm_eff * Dp * 4 + tm_eff * cand * (4 + w_bytes)
                       + (2 << 20))
                if est <= usable:
                    th = cand
                    break
        n_k_steps = Dp // th
        stream_bytes = (2 * Dp * th * w_bytes + 2 * th * Dp * w_bytes
                        + 2 * tm_eff * Dp * x_bytes + 2 * tm_eff * Dp * o_bytes
                        + tm_eff * Dp * 4 + tm_eff * th * (4 + w_bytes)
                        + (2 << 20))
        bytes_accessed = (rows * Dp * x_bytes + rows * Dp * o_bytes
                          + n_row_steps * 2 * Dp * Dp * w_bytes + 2 * Dp * 4)
        cost = pl.CostEstimate(flops=int(flops), transcendentals=0,
                               bytes_accessed=int(bytes_accessed))
        compiler_kwargs = dict(dimension_semantics=("parallel", "arbitrary"))
        if 2 * stream_bytes > (16 << 20):
            compiler_kwargs["vmem_limit_bytes"] = int(
                max(32 << 20, min(2 * stream_bytes, usable)))

        grid_spec = pltpu.PrefetchScalarGridSpec(
            num_scalar_prefetch=0,
            grid=(n_row_steps, n_k_steps),
            in_specs=[
                pl.BlockSpec((tm_eff, Dp), lambda i, k: (i, 0)),  # x (resident over k)
                pl.BlockSpec((Dp, th), lambda i, k: (0, k)),      # W1 column slab
                pl.BlockSpec((1, th), lambda i, k: (0, k)),       # b1 slab
                pl.BlockSpec((th, Dp), lambda i, k: (k, 0)),      # W2 row slab
                pl.BlockSpec((1, Dp), lambda i, k: (0, 0)),       # b2
            ],
            out_specs=pl.BlockSpec((tm_eff, Dp), lambda i, k: (i, 0)),
            scratch_shapes=[pltpu.VMEM((tm_eff, Dp), jnp.float32)],
        )
        out2d = pl.pallas_call(
            _ffn_stream_kernel,
            out_shape=jax.ShapeDtypeStruct((rows, Dp), out_dtype),
            grid_spec=grid_spec,
            cost_estimate=cost,
            compiler_params=pltpu.CompilerParams(**compiler_kwargs),
        )(x2d, w1, b1_2d, w2, b2_2d)

    return out2d[:, :D].reshape(orig_shape)


if __name__ == "__main__":
    key = jax.random.PRNGKey(0)
    batch, seq, dim_ff = 2, 8, 32

    k_x, k_w1, k_b1, k_w2, k_b2 = jax.random.split(key, 5)
    bound = 1.0 / math.sqrt(dim_ff)

    x = jax.random.normal(k_x, (batch, seq, dim_ff), dtype=jnp.float32)
    # PyTorch nn.Linear stores weight as (out, in); pre-transpose to (in, out).
    w1_t = jax.random.uniform(k_w1, (dim_ff, dim_ff), jnp.float32, -bound, bound)
    b1 = jax.random.uniform(k_b1, (dim_ff,), jnp.float32, -bound, bound)
    w2_t = jax.random.uniform(k_w2, (dim_ff, dim_ff), jnp.float32, -bound, bound)
    b2 = jax.random.uniform(k_b2, (dim_ff,), jnp.float32, -bound, bound)
    w1, w2 = w1_t.T, w2_t.T

    ref = jnp.maximum(x @ w1 + b1, 0.0) @ w2 + b2

    # 1) resident-weight path, f32 MXU (exact).
    out_f32 = feed_forward_block(x, w1, b1, w2, b2)
    jax.block_until_ready(out_f32)
    assert out_f32.shape == x.shape and out_f32.dtype == x.dtype
    assert jnp.allclose(out_f32, ref, atol=1e-5, rtol=1e-5), "f32 path mismatch"

    # 2) bf16 MXU inputs, f32 accumulation (loose tolerance).
    out_bf16 = feed_forward_block(x, w1, b1, w2, b2, compute_dtype=jnp.bfloat16)
    jax.block_until_ready(out_bf16)
    assert jnp.allclose(out_bf16, ref, atol=5e-2, rtol=5e-2), "bf16 path mismatch"

    # 3) weight-streaming (hidden-dim tiled) path, forced at a larger D so the
    #    multi-slab f32 accumulator is exercised (still exact).
    dim_big = 320
    kb = jax.random.split(jax.random.PRNGKey(1), 5)
    bound_b = 1.0 / math.sqrt(dim_big)
    xb = jax.random.normal(kb[0], (batch, seq, dim_big), dtype=jnp.float32)
    w1b = jax.random.uniform(kb[1], (dim_big, dim_big), jnp.float32, -bound_b, bound_b).T
    b1b = jax.random.uniform(kb[2], (dim_big,), jnp.float32, -bound_b, bound_b)
    w2b = jax.random.uniform(kb[3], (dim_big, dim_big), jnp.float32, -bound_b, bound_b).T
    b2b = jax.random.uniform(kb[4], (dim_big,), jnp.float32, -bound_b, bound_b)
    ref_b = jnp.maximum(xb @ w1b + b1b, 0.0) @ w2b + b2b
    out_stream = feed_forward_block(xb, w1b, b1b, w2b, b2b,
                                    force_streaming=True, hidden_tile=128)
    jax.block_until_ready(out_stream)
    assert jnp.allclose(out_stream, ref_b, atol=1e-5, rtol=1e-5), \
        "streaming path mismatch"

    print("KERNEL_OK")
</pallas_src>

<mosaic_0001>
module attributes {stable_mosaic.version = 11 : i64} {
  func.func @_ffn_resident_kernel(%arg0: i32, %arg1: memref<16x128xf32, #tpu.memory_space<vmem>>, %arg2: memref<128x128xf32, #tpu.memory_space<vmem>>, %arg3: memref<1x128xf32, #tpu.memory_space<vmem>>, %arg4: memref<128x128xf32, #tpu.memory_space<vmem>>, %arg5: memref<1x128xf32, #tpu.memory_space<vmem>>, %arg6: memref<16x128xf32, #tpu.memory_space<vmem>>) attributes {dimension_semantics = [#tpu.dimension_semantics<parallel>], iteration_bounds = array<i64: 1>, scalar_prefetch = 0 : i64, scratch_operands = 0 : i64, tpu.core_type = #tpu.core_type<tc>, window_params = [{transform_indices = @transform_0, window_bounds = array<i64: 16, 128>}, {pipeline_mode = #tpu.pipeline_mode<synchronous>, transform_indices = @transform_1, window_bounds = array<i64: 128, 128>}, {pipeline_mode = #tpu.pipeline_mode<synchronous>, transform_indices = @transform_2, window_bounds = array<i64: 1, 128>}, {pipeline_mode = #tpu.pipeline_mode<synchronous>, transform_indices = @transform_3, window_bounds = array<i64: 128, 128>}, {pipeline_mode = #tpu.pipeline_mode<synchronous>, transform_indices = @transform_4, window_bounds = array<i64: 1, 128>}, {transform_indices = @transform_5, window_bounds = array<i64: 16, 128>}]} {
    %c0 = arith.constant 0 : index
    %c0_0 = arith.constant 0 : index
    %0 = vector.load %arg3[%c0, %c0_0] : memref<1x128xf32, #tpu.memory_space<vmem>>, vector<1x128xf32>
    %c0_1 = arith.constant 0 : index
    %c0_2 = arith.constant 0 : index
    %1 = vector.load %arg5[%c0_1, %c0_2] : memref<1x128xf32, #tpu.memory_space<vmem>>, vector<1x128xf32>
    %c0_3 = arith.constant 0 : index
    %c0_4 = arith.constant 0 : index
    %2 = vector.load %arg1[%c0_3, %c0_4] : memref<16x128xf32, #tpu.memory_space<vmem>>, vector<16x128xf32>
    %c0_5 = arith.constant 0 : index
    %c0_6 = arith.constant 0 : index
    %3 = vector.load %arg2[%c0_5, %c0_6] : memref<128x128xf32, #tpu.memory_space<vmem>>, vector<128x128xf32>
    %cst = arith.constant dense<0.000000e+00> : vector<16x128xf32>
    %4 = tpu.matmul %2, %3, %cst {dimension_numbers = #tpu.dot_dimension_numbers<[1], [0], [0], [1], [0, 0, 1, 1], [], []>} : vector<16x128xf32>, vector<128x128xf32>, vector<16x128xf32> -> vector<16x128xf32>
    %5 = vector.broadcast %0 : vector<1x128xf32> to vector<16x128xf32>
    %6 = arith.addf %4, %5 : vector<16x128xf32>
    %cst_7 = arith.constant 0.000000e+00 : f32
    %7 = vector.broadcast %cst_7 : f32 to vector<16x128xf32>
    %8 = arith.maximumf %6, %7 : vector<16x128xf32>
    %c0_8 = arith.constant 0 : index
    %c0_9 = arith.constant 0 : index
    %9 = vector.load %arg4[%c0_8, %c0_9] : memref<128x128xf32, #tpu.memory_space<vmem>>, vector<128x128xf32>
    %cst_10 = arith.constant dense<0.000000e+00> : vector<16x128xf32>
    %10 = tpu.matmul %8, %9, %cst_10 {dimension_numbers = #tpu.dot_dimension_numbers<[1], [0], [0], [1], [0, 0, 1, 1], [], []>} : vector<16x128xf32>, vector<128x128xf32>, vector<16x128xf32> -> vector<16x128xf32>
    %11 = vector.broadcast %1 : vector<1x128xf32> to vector<16x128xf32>
    %12 = arith.addf %10, %11 : vector<16x128xf32>
    %c0_11 = arith.constant 0 : index
    %c0_12 = arith.constant 0 : index
    %13 = vector.load %arg6[%c0_11, %c0_12] : memref<16x128xf32, #tpu.memory_space<vmem>>, vector<16x128xf32>
    tpu.vector_store %arg6[%c0_11, %c0_12], %12 {strides = array<i32>} : memref<16x128xf32, #tpu.memory_space<vmem>>, vector<16x128xf32>,
    return
  }
  func.func @transform_0(%arg0: i32) -> (i32, i32) {
    %c0_i32 = arith.constant 0 : i32
    %c0_i32_0 = arith.constant 0 : i32
    return %arg0, %c0_i32 : i32, i32
  }
  func.func @transform_1(%arg0: i32) -> (i32, i32) {
    %c0_i32 = arith.constant 0 : i32
    %c0_i32_0 = arith.constant 0 : i32
    %c0_i32_1 = arith.constant 0 : i32
    return %c0_i32, %c0_i32_0 : i32, i32
  }
  func.func @transform_2(%arg0: i32) -> (i32, i32) {
    %c0_i32 = arith.constant 0 : i32
    %c0_i32_0 = arith.constant 0 : i32
    %c0_i32_1 = arith.constant 0 : i32
    return %c0_i32, %c0_i32_0 : i32, i32
  }
  func.func @transform_3(%arg0: i32) -> (i32, i32) {
    %c0_i32 = arith.constant 0 : i32
    %c0_i32_0 = arith.constant 0 : i32
    %c0_i32_1 = arith.constant 0 : i32
    return %c0_i32, %c0_i32_0 : i32, i32
  }
  func.func @transform_4(%arg0: i32) -> (i32, i32) {
    %c0_i32 = arith.constant 0 : i32
    %c0_i32_0 = arith.constant 0 : i32
    %c0_i32_1 = arith.constant 0 : i32
    return %c0_i32, %c0_i32_0 : i32, i32
  }
  func.func @transform_5(%arg0: i32) -> (i32, i32) {
    %c0_i32 = arith.constant 0 : i32
    %c0_i32_0 = arith.constant 0 : i32
    return %arg0, %c0_i32 : i32, i32
  }
}

</mosaic_0001>

<bundles_post_ra>
// kernel: tpu_custom_call.1
= control target key start
LH: loop header
LB: loop body
LE: loop exit
PB: predicated region body
PF: predicated region fallthrough
CT: control target
= control target key end

     0   :  { %10 = vsyncpa [#allocation3], 0  ;;  %s548_s0 = inlined_call_operand.hbm [shape: f32[16,128], index: 0, kind: input, shape index: {}]   ;;  %s549_s1 = inlined_call_operand.hbm [shape: f32[128,128], index: 1, kind: input, shape index: {}]   ;;  %s550_s2 = inlined_call_operand.vmem [shape: f32[1,128], index: 2, kind: input, shape index: {}]   ;;  %s551_s3 = inlined_call_operand.hbm [shape: f32[128,128], index: 3, kind: input, shape index: {}]   ;;  %s552_s4 = inlined_call_operand.vmem [shape: f32[1,128], index: 4, kind: input, shape index: {}]   ;;  %s553_s5 = inlined_call_operand.hbm [shape: f32[16,128], index: 5, kind: output, shape index: {}]  }
   0x1   :  { %11 = vsyncpa [#allocation6], 0 }
   0x2   :  { %12 = vsyncpa [#allocation4], 0  ;;  %s482_s18 = smov [#allocation5]   ;;  %s483_s20 = smov [#allocation2]  }
   0x3   :  { %s30_s19 = sshll.u32 %s482_s18, 4  ;;  %s18_s21 = sshll.u32 %s483_s20, 4  ;;  %s31_s19 = int_to_ptr.vmem [resolvable:$true] %s30_s19  ;;  %s19_s21 = int_to_ptr.vmem [resolvable:$true] %s18_s21 }
   0x4   :  { %s404_s22 = scalar_lea.vmem %s31_s19, 2048  ;;  %p409_p1 = scmp.lt.s32.totalorder %s31_s19, %s31_s19 }
   0x5   :  { %p405_p0 = scmp.ne.s32.totalorder %s31_s19, %s404_s22  ;;  %p410_p2 = scmp.lt.s32.totalorder %s404_s22, %s404_s22 }
   0x7   :  { %p411_p3 = por %p410_p2, %p409_p1 }
   0x9   :  { %p412_p4 = pnand %p411_p3, %p405_p0 }
   0xb   :  { %415 = shalt.err (!%p412_p4)
}
   0xc   :  { %s484_s23 = smov 128   ;;  %s485_s24 = smov 8  }
   0xd   :  { %36 = dma.hbm_to_vmem [thread:$0]  %s549_s1, 2048, %s31_s19, [#allocation6], %s484_s23, %s484_s23, %s485_s24  }
   0xe   :  { %s424_s27 = scalar_lea.vmem %s19_s21, 256  ;;  %p429_p6 = scmp.lt.s32.totalorder %s19_s21, %s19_s21 }
   0xf   :  { %p425_p5 = scmp.ne.s32.totalorder %s19_s21, %s424_s27  ;;  %p430_p7 = scmp.lt.s32.totalorder %s424_s27, %s424_s27 }
  0x11   :  { %p431_p8 = por %p430_p7, %p429_p6 }
  0x13   :  { %p432_p9 = pnand %p431_p8, %p425_p5 }
  0x15   :  { %435 = shalt.err (!%p432_p9)
}
  0x16   :  { %24 = dma.hbm_to_vmem [thread:$0]  %s548_s0, 256, %s19_s21, [#allocation3], %s484_s23, %s484_s23, %s485_s24  }
  0x17   :  { %s486_s30 = smov [#allocation7]  }
  0x18   :  { %s44_s6 = sshll.u32 %s486_s30, 4  ;;  %s45_s6 = int_to_ptr.vmem [resolvable:$true] %s44_s6 }
  0x19   :  { %s444_s7 = scalar_lea.vmem %s45_s6, 2048  ;;  %p449_p11 = scmp.lt.s32.totalorder %s45_s6, %s45_s6 }
  0x1a   :  { %p445_p10 = scmp.ne.s32.totalorder %s45_s6, %s444_s7  ;;  %p450_p12 = scmp.lt.s32.totalorder %s444_s7, %s444_s7 }
  0x1c   :  { %p451_p13 = por %p450_p12, %p449_p11 }
  0x1e   :  { %p452_p0 = pnand %p451_p13, %p445_p10 }
  0x20   :  { %455 = shalt.err (!%p452_p0)
}
  0x21   :  { %50 = dma.hbm_to_vmem [thread:$0]  %s551_s3, 2048, %s45_s6, [#allocation6], %s484_s23, %s484_s23, %s485_s24  }
  0x22   :  { %476 = dma.done.wait [#allocation3], 256  }
  0x23   :  { %477 = vsyncadd [#allocation3], 4294967040 }
  0x24   :  { %478 = dma.done.wait [#allocation6], 4096  }
  0x25   :  { %479 = vsyncadd [#allocation6], 4294963200  ;;  %v81_v0 = vld [vmem:[#allocation5 + $0x78] sm:$0xff]  ;;  %v80_v1 = vld [vmem:[#allocation5 + $0x70] sm:$0xff]  ;;  %s487_s11 = smov [#allocation8]  }
  0x26   :  { %320 = vmatprep.subr.mxu0 %v81_v0  ;;  %v79_v2 = vld [vmem:[#allocation5 + $0x68] sm:$0xff]  ;;  %v78_v3 = vld [vmem:[#allocation5 + $0x60] sm:$0xff]  ;;  %v64_v4 = vld [vmem:[#allocation2] sm:$0xff]  ;;  %s269_s12 = sshll.u32 %s487_s11, 4  ;;  %s270_s12 = int_to_ptr.vmem [resolvable:$true] %s269_s12 }
  0x27   :  { %321 = vmatpush3.msra.mxu0 %v81_v0  ;;  %v77_v5 = vld [vmem:[#allocation5 + $0x58] sm:$0xff]  ;;  %352 = vmatprep.mubr.f32.mxu0 %v64_v4  ;;  %v179_v7 = vld [vmem:[#allocation7 + $0x70] sm:$0xff]  ;;  %v178_v9 = vld [vmem:[#allocation7 + $0x68] sm:$0xff]  ;;  %p461_p2 = scmp.lt.s32.totalorder %s270_s12, %s270_s12 }
  0x28   :  { %322 = vmatprep.subr.mxu0 %v80_v1  ;;  %v180_v6 = vld [vmem:[#allocation7 + $0x78] sm:$0xff]  ;;  %v76_v8 = vld [vmem:[#allocation5 + $0x50] sm:$0xff]  ;;  %v75_v10 = vld [vmem:[#allocation5 + $0x48] sm:$0xff] }
  0x29   :  { %323 = vmatpush3.msra.mxu0 %v80_v1  ;;  %355 = vmatprep.subr.mxu1 %v180_v6  ;;  %v177_v11 = vld [vmem:[#allocation7 + $0x60] sm:$0xff]  ;;  %v176_v13 = vld [vmem:[#allocation7 + $0x58] sm:$0xff]  ;;  %v175_v15 = vld [vmem:[#allocation7 + $0x50] sm:$0xff] }
  0x2a   :  { %324 = vmatprep.subr.mxu0 %v79_v2  ;;  %356 = vmatpush3.msra.mxu1 %v180_v6  ;;  %v74_v12 = vld [vmem:[#allocation5 + $0x40] sm:$0xff]  ;;  %v73_v14 = vld [vmem:[#allocation5 + $0x38] sm:$0xff]  ;;  %v72_v16 = vld [vmem:[#allocation5 + $0x30] sm:$0xff] }
  0x2b   :  { %325 = vmatpush3.msra.mxu0 %v79_v2  ;;  %357 = vmatprep.subr.mxu1 %v179_v7  ;;  %v174_v17 = vld [vmem:[#allocation7 + $0x48] sm:$0xff]  ;;  %v173_v19 = vld [vmem:[#allocation7 + $0x40] sm:$0xff]  ;;  %v172_v21 = vld [vmem:[#allocation7 + $0x38] sm:$0xff] }
  0x2c   :  { %326 = vmatprep.subr.mxu0 %v78_v3  ;;  %358 = vmatpush3.msra.mxu1 %v179_v7  ;;  %v71_v18 = vld [vmem:[#allocation5 + $0x28] sm:$0xff]  ;;  %v70_v20 = vld [vmem:[#allocation5 + $0x20] sm:$0xff]  ;;  %v69_v22 = vld [vmem:[#allocation5 + $0x18] sm:$0xff] }
  0x2d   :  { %327 = vmatpush3.msra.mxu0 %v78_v3  ;;  %359 = vmatprep.subr.mxu1 %v178_v9  ;;  %v171_v23 = vld [vmem:[#allocation7 + $0x30] sm:$0xff]  ;;  %v170_v25 = vld [vmem:[#allocation7 + $0x28] sm:$0xff]  ;;  %v169_v27 = vld [vmem:[#allocation7 + $0x20] sm:$0xff] }
  0x2e   :  { %328 = vmatprep.subr.mxu0 %v77_v5  ;;  %360 = vmatpush3.msra.mxu1 %v178_v9  ;;  %v68_v24 = vld [vmem:[#allocation5 + $0x10] sm:$0xff]  ;;  %v67_v26 = vld [vmem:[#allocation5 + $0x8] sm:$0xff]  ;;  %v66_v28 = vld [vmem:[#allocation5] sm:$0xff] }
  0x2f   :  { %329 = vmatpush3.msra.mxu0 %v77_v5  ;;  %361 = vmatprep.subr.mxu1 %v177_v11  ;;  %v65_v29 = vld [vmem:[#allocation2 + $0x8] sm:$0xff]  ;;  %v167_v31 = vld [vmem:[#allocation7 + $0x10] sm:$0xff]  ;;  %v166_v32 = vld [vmem:[#allocation7 + $0x8] sm:$0xff] }
  0x30   :  { %330 = vmatprep.subr.mxu0 %v76_v8  ;;  %362 = vmatpush3.msra.mxu1 %v177_v11  ;;  %v168_v30 = vld [vmem:[#allocation7 + $0x18] sm:$0xff]  ;;  %v165_v33 = vld [vmem:[#allocation7] sm:$0xff]  ;;  %v282_v34 = vld [vmem:[%s550_s2] ss:$0 sm:$0xff]  ;;  %s456_s2 = scalar_lea.vmem %s270_s12, 256 }
  0x31   :  { %331 = vmatpush3.msra.mxu0 %v76_v8  ;;  %363 = vmatprep.subr.mxu1 %v176_v13  ;;  %v283_v41 = vld [vmem:[%s552_s4] ss:$0 sm:$0xff]  ;;  %p457_p1 = scmp.ne.s32.totalorder %s270_s12, %s456_s2  ;;  %p462_p3 = scmp.lt.s32.totalorder %s456_s2, %s456_s2 }
  0x32   :  { %332 = vmatprep.subr.mxu0 %v75_v10  ;;  %364 = vmatpush3.msra.mxu1 %v176_v13 }
  0x33   :  { %333 = vmatpush3.msra.mxu0 %v75_v10  ;;  %365 = vmatprep.subr.mxu1 %v175_v15  ;;  %p463_p4 = por %p462_p3, %p461_p2 }
  0x34   :  { %334 = vmatprep.subr.mxu0 %v74_v12  ;;  %366 = vmatpush3.msra.mxu1 %v175_v15 }
  0x35   :  { %335 = vmatpush3.msra.mxu0 %v74_v12  ;;  %367 = vmatprep.subr.mxu1 %v174_v17  ;;  %p464_p5 = pnand %p463_p4, %p457_p1 }
  0x36   :  { %336 = vmatprep.subr.mxu0 %v73_v14  ;;  %368 = vmatpush3.msra.mxu1 %v174_v17 }
  0x37   :  { %337 = vmatpush3.msra.mxu0 %v73_v14  ;;  %369 = vmatprep.subr.mxu1 %v173_v19 }
  0x38   :  { %338 = vmatprep.subr.mxu0 %v72_v16  ;;  %370 = vmatpush3.msra.mxu1 %v173_v19 }
  0x39   :  { %339 = vmatpush3.msra.mxu0 %v72_v16  ;;  %371 = vmatprep.subr.mxu1 %v172_v21 }
  0x3a   :  { %340 = vmatprep.subr.mxu0 %v71_v18  ;;  %372 = vmatpush3.msra.mxu1 %v172_v21 }
  0x3b   :  { %341 = vmatpush3.msra.mxu0 %v71_v18  ;;  %373 = vmatprep.subr.mxu1 %v171_v23 }
  0x3c   :  { %342 = vmatprep.subr.mxu0 %v70_v20  ;;  %374 = vmatpush3.msra.mxu1 %v171_v23 }
  0x3d   :  { %343 = vmatpush3.msra.mxu0 %v70_v20  ;;  %375 = vmatprep.subr.mxu1 %v170_v25 }
  0x3e   :  { %344 = vmatprep.subr.mxu0 %v69_v22  ;;  %376 = vmatpush3.msra.mxu1 %v170_v25 }
  0x3f   :  { %345 = vmatpush3.msra.mxu0 %v69_v22  ;;  %377 = vmatprep.subr.mxu1 %v169_v27 }
  0x40   :  { %346 = vmatprep.subr.mxu0 %v68_v24  ;;  %378 = vmatpush3.msra.mxu1 %v169_v27 }
  0x41   :  { %347 = vmatpush3.msra.mxu0 %v68_v24  ;;  %379 = vmatprep.subr.mxu1 %v168_v30 }
  0x42   :  { %348 = vmatprep.subr.mxu0 %v67_v26  ;;  %380 = vmatpush3.msra.mxu1 %v168_v30 }
  0x43   :  { %349 = vmatpush3.msra.mxu0 %v67_v26  ;;  %381 = vmatprep.subr.mxu1 %v167_v31 }
  0x44   :  { %350 = vmatprep.subr.mxu0 %v66_v28  ;;  %382 = vmatpush3.msra.mxu1 %v167_v31 }
  0x45   :  { %351 = vmatpush3.msra.mxu0 %v66_v28  ;;  %383 = vmatprep.subr.mxu1 %v166_v32 }
  0x46   :  { %353 = vmatmul.mubr.f32.vlgmr.msra.gmra.mxu0 %v65_v29  ;;  %384 = vmatpush3.msra.mxu1 %v166_v32 }
  0x47   :  { %385 = vmatprep.subr.mxu1 %v165_v33 }
  0x48   :  { %386 = vmatpush3.msra.mxu1 %v165_v33 }
 0x106   :  { %v354_v35 = vpop.f32.mrf.mxu0 }
 0x107   :  { %v160_v36 = vadd.f32 %v354_v35, %v282_v34 }
 0x108   :  { %v154_v37 = vpop.f32.mrf.mxu0 }
 0x109   :  { %v155_v38 = vadd.f32 %v282_v34, %v154_v37  ;;  %v164_v40 = vmax.f32 %v160_v36, 0.0 }
 0x10b   :  { %v163_v39 = vmax.f32 %v155_v38, 0.0 }
 0x10d   :  { %387 = vmatprep.mubr.f32.mxu1 %v163_v39 }
 0x10e   :  { %388 = vmatmul.mubr.f32.vlgmr.msra.gmra.mxu1 %v164_v40 }
 0x1ce   :  { %v389_v42 = vpop.f32.mrf.mxu1 }
 0x1cf   :  { %v259_v43 = vadd.f32 %v389_v42, %v283_v41 }
 0x1d0   :  { %v253_v44 = vpop.f32.mrf.mxu1 }
 0x1d1   :  { %263 = vst [vmem:[#allocation8 + $0x8] sm:$0xff] %v259_v43  ;;  %v254_v45 = vadd.f32 %v283_v41, %v253_v44 }
 0x1d3   :  { %262 = vst [vmem:[#allocation8] sm:$0xff] %v254_v45 }
 0x1d4   :  { %467 = shalt.err (!%p464_p5)
}
 0x1d5   :  { %275 = dma.vmem_to_hbm [thread:$0]  %s270_s12, 256, %s553_s5, [#allocation4], %s484_s23, %s484_s23, %s485_s24  }
 0x1d6   :  { %480 = dma.done.wait [#allocation4], 256  }
 0x1d7   :  { %481 = vsyncadd [#allocation4], 4294967040 }
 0x1d8   :  { %279 = vsyncpa [#allocation3], 1 }
 0x1d9   :  { %280 = vsyncpa [#allocation6], 1 }
 0x1da   :  { %281 = vsyncpa [#allocation4], 1 }

</bundles_post_ra>
